<compile_context>
chip_gen: v7x
topology: tpu7x:2x2x1
jax: 0.10.0
libtpu: 0.0.40
codegen_flags: <defaults>
</compile_context>

<pallas_src>
import functools

import jax
import jax.numpy as jnp
from jax.experimental import pallas as pl
from jax.experimental.pallas import tpu as pltpu

_PREC = jax.lax.Precision.HIGHEST
_MIB = 1024 * 1024

# I/O dtype for the Pallas matmul paths.  f32 keeps parity with the torch module;
# flip to jnp.bfloat16 on v6e/v7x (halves HBM traffic on the mem-bound gram /
# linear1 paths, ~4x MXU peak) if accuracy allows.  Accumulation / LayerNorm math
# stays f32 regardless.
_IO_DTYPE = jnp.float32


# --------------------------------------------------------------------------- #
# generation-aware VMEM config & block-picking helpers
# --------------------------------------------------------------------------- #

def _round_up(x, m):
    return ((x + m - 1) // m) * m


@functools.lru_cache(maxsize=None)
def _vmem_config():
    """(single-buffered per-step block budget, vmem_limit_bytes or None)."""
    kind = ""
    try:
        kind = jax.devices()[0].device_kind.lower()
    except Exception:  # pragma: no cover
        pass
    if "v6" in kind:
        return 12 * _MIB, 96 * _MIB     # 128 MiB physical VMEM
    if "v7" in kind:
        return 8 * _MIB, 48 * _MIB      # only 64 MiB physical VMEM per TC
    if "v5" in kind:
        return 6 * _MIB, 48 * _MIB      # 16 MiB default scoped limit -> raise it
    return 6 * _MIB, None


def _compiler_params(dimension_semantics):
    _, limit = _vmem_config()
    kwargs = dict(dimension_semantics=dimension_semantics)
    if limit is not None:
        kwargs["vmem_limit_bytes"] = limit
    return pltpu.CompilerParams(**kwargs)


def _pick_batch_block(b, per_item_bytes):
    """Leading-dim batch block (tb, padded_b) for the batched gram kernel."""
    budget, _ = _vmem_config()
    cap = max(1, budget // max(per_item_bytes, 1))
    tb = min(cap, b)
    if b >= 2:                                   # >= 2 grid steps (megacore / pipelining)
        tb = max(1, min(tb, -(-b // 2)))
    steps = -(-b // tb)
    tb = -(-b // steps)                          # rebalance -> minimal batch padding
    return tb, steps * tb


def _pick_clip_block(b, per_item_bytes):
    """Lane-dim batch block (tb, padded_b); tb is a multiple of 128 or the full batch."""
    budget, _ = _vmem_config()
    cap = max(1, budget // max(per_item_bytes, 1))
    if b <= cap:
        if b >= 256 and b % 256 == 0:
            return b // 2, b                     # two lane-dense steps (megacore)
        return b, b                              # single step, block == full array
    tb = max(128, (min(cap, 1024) // 128) * 128)
    steps = -(-b // tb)
    tb = _round_up(-(-b // steps), 128)
    return tb, steps * tb


def _pick_rows_block(b, max_rows=256):
    """Sublane-aligned row block (tb, padded_b) for 2D (rows, feature) arrays."""
    tb = min(max_rows, _round_up(b, 8))
    steps = -(-b // tb)
    if steps == 1 and b > 8:                     # allow 2 steps when there is work
        tb = min(tb, _round_up(-(-b // 2), 8))
        steps = -(-b // tb)
    tb = _round_up(-(-b // steps), 8)
    return tb, steps * tb


def _pick_reduce_block(t_pad, tb, hh):
    """Reduction-dim tile for the head MLP (x block tb x tkt, w1 block tkt x hh)."""
    budget, _ = _vmem_config()
    for c in (4096, 2048, 1024, 512, 256, 128):
        if t_pad % c == 0 and 4 * c * (tb + hh) <= budget:
            return c
    if t_pad % 128 == 0:
        return 128
    return t_pad


# --------------------------------------------------------------------------- #
# InvariantOutput kernels
# --------------------------------------------------------------------------- #

def _gram_kernel(u_ref, v_ref, o_ref):
    # u_ref: (TB, n, k), v_ref: (TB, m, k), o_ref: (TB, n, m); contraction on the
    # last dims -> no in-kernel transpose of v.
    o_ref[...] = jnp.einsum(
        "bnk,bmk->bnm", u_ref[...], v_ref[...],
        preferred_element_type=jnp.float32,
    ).astype(o_ref.dtype)


def _gram_tiled_kernel(u_ref, v_ref, o_ref, acc_ref):
    # u_ref: (1, tn, tk), v_ref: (1, tm, tk), o_ref: (1, tn, tm), acc: (tn, tm) f32
    @pl.when(pl.program_id(3) == 0)
    def _init():
        acc_ref[...] = jnp.zeros_like(acc_ref)

    acc_ref[...] += jnp.einsum(
        "nk,mk->nm", u_ref[0], v_ref[0], preferred_element_type=jnp.float32)

    @pl.when(pl.program_id(3) == pl.num_programs(3) - 1)
    def _done():
        o_ref[0] = acc_ref[...].astype(o_ref.dtype)


def _gram_mean_kernel(u_ref, v_ref, o_ref, *, inv_nm):
    # mean_{i,j}(u @ v^T) = (1/(n*m)) * dot(sum_i u[i,:], sum_j v[j,:])
    su = jnp.sum(u_ref[...].astype(jnp.float32), axis=1)     # (TB, k)
    sv = jnp.sum(v_ref[...].astype(jnp.float32), axis=1)     # (TB, k)
    val = jnp.sum(su * sv, axis=-1) * inv_nm                  # (TB,)
    o_ref[...] = val[None, :].astype(o_ref.dtype)             # lane-dense (1, TB)


def _gram_batched_call(u, v, tb):
    b, n, k = u.shape
    m = v.shape[1]
    isz = u.dtype.itemsize
    cost = pl.CostEstimate(
        flops=2 * b * n * m * k, transcendentals=0,
        bytes_accessed=isz * (b * n * k + b * m * k) + 4 * b * n * m)
    return pl.pallas_call(
        _gram_kernel,
        out_shape=jax.ShapeDtypeStruct((b, n, m), jnp.float32),
        grid_spec=pltpu.PrefetchScalarGridSpec(
            num_scalar_prefetch=0,
            grid=(b // tb,),
            in_specs=[
                pl.BlockSpec((tb, n, k), lambda i: (i, 0, 0)),
                pl.BlockSpec((tb, m, k), lambda i: (i, 0, 0)),
            ],
            out_specs=pl.BlockSpec((tb, n, m), lambda i: (i, 0, 0)),
        ),
        compiler_params=_compiler_params(("parallel",)),
        cost_estimate=cost,
    )(u, v)


def _gram_tiled_call(u, v, tn, tm, tk):
    b, n, k = u.shape
    m = v.shape[1]
    isz = u.dtype.itemsize
    cost = pl.CostEstimate(
        flops=2 * b * n * m * k, transcendentals=0,
        bytes_accessed=isz * (b * n * k + b * m * k) + 4 * b * n * m)
    return pl.pallas_call(
        _gram_tiled_kernel,
        out_shape=jax.ShapeDtypeStruct((b, n, m), jnp.float32),
        grid_spec=pltpu.PrefetchScalarGridSpec(
            num_scalar_prefetch=0,
            grid=(b, n // tn, m // tm, k // tk),
            in_specs=[
                pl.BlockSpec((1, tn, tk), lambda bb, i, j, kk: (bb, i, kk)),
                pl.BlockSpec((1, tm, tk), lambda bb, i, j, kk: (bb, j, kk)),
            ],
            out_specs=pl.BlockSpec((1, tn, tm), lambda bb, i, j, kk: (bb, i, j)),
            scratch_shapes=[pltpu.VMEM((tn, tm), jnp.float32)],
        ),
        compiler_params=_compiler_params(
            ("parallel", "parallel", "parallel", "arbitrary")),
        cost_estimate=cost,
    )(u, v)


def _gram_mean_call(u, v, tb):
    b, n, k = u.shape
    m = v.shape[1]
    g = b // tb
    kern = functools.partial(_gram_mean_kernel, inv_nm=1.0 / float(n * m))
    return pl.pallas_call(
        kern,
        out_shape=jax.ShapeDtypeStruct((1, b), jnp.float32),
        grid_spec=pltpu.PrefetchScalarGridSpec(
            num_scalar_prefetch=0,
            grid=(g,),
            in_specs=[
                pl.BlockSpec((tb, n, k), lambda i: (i, 0, 0)),
                pl.BlockSpec((tb, m, k), lambda i: (i, 0, 0)),
            ],
            out_specs=pl.BlockSpec((1, tb), lambda i: (0, i)),
        ),
        compiler_params=_compiler_params(("parallel",)),
    )(u, v)


def invariant_output(u, v, *, clip=False, force_tiled=False):
    """Pallas implementation of InvariantOutput.forward.

    clip=False: (B, n, k), (B, m, k) -> (B, n, m)   [u @ v^T per batch]
    clip=True : (B, n, k), (B, m, k) -> (B, 1)      [mean over (n, m)]
    """
    u = jnp.asarray(u, _IO_DTYPE)
    v = jnp.asarray(v, _IO_DTYPE)
    b, n, k = u.shape
    bv, m, kv = v.shape
    assert b == bv and k == kv
    isz = jnp.dtype(_IO_DTYPE).itemsize

    if clip:
        per_item = isz * (n * k + m * k)
        tb, b_pad = _pick_clip_block(b, per_item)
        if b_pad != b:
            u = jnp.pad(u, ((0, b_pad - b), (0, 0), (0, 0)))
            v = jnp.pad(v, ((0, b_pad - b), (0, 0), (0, 0)))
        out = _gram_mean_call(u, v, tb)                       # (1, b_pad)
        return out[0, :b].reshape(b, 1)

    per_item = isz * (n * k + m * k) + 4 * n * m
    budget, _ = _vmem_config()
    tileable = (n % 128 == 0) and (m % 128 == 0) and (k % 128 == 0)
    if force_tiled or (per_item > budget and tileable):
        assert tileable, "tiled path requires n, m, k divisible by 128"

        def _tile(d):
            for c in (512, 256, 128):
                if d % c == 0:
                    return c
            return 128

        return _gram_tiled_call(u, v, _tile(n), _tile(m), _tile(k))

    # TODO(synk): large non-128-divisible n/m/k would want a padded tiled path;
    # for now the raised vmem_limit_bytes + small TB keeps this fallback safe.
    tb, b_pad = _pick_batch_block(b, per_item)
    if b_pad != b:
        u = jnp.pad(u, ((0, b_pad - b), (0, 0), (0, 0)))
        v = jnp.pad(v, ((0, b_pad - b), (0, 0), (0, 0)))
    out = _gram_batched_call(u, v, tb)
    return out[:b]


# --------------------------------------------------------------------------- #
# Fused InvariantHead MLP kernel: linear1 (t-tiled) + LayerNorm + ReLU + linear2
# --------------------------------------------------------------------------- #

def _head_mlp_kernel(x_ref, w1_ref, b1_ref, g_ref, bt_ref, w2_ref, b2_ref,
                     o_ref, acc_ref):
    kk = pl.program_id(1)

    @pl.when(kk == 0)
    def _init():
        acc_ref[...] = jnp.zeros_like(acc_ref)

    # Streamed linear1: (tb, tkt) @ (tkt, Hinv) accumulated in f32 VMEM scratch.
    acc_ref[...] += jnp.dot(x_ref[...], w1_ref[...],
                            preferred_element_type=jnp.float32)

    @pl.when(kk == pl.num_programs(1) - 1)
    def _epilogue():
        h = acc_ref[...] + b1_ref[...]
        mu = jnp.mean(h, axis=-1, keepdims=True)
        d = h - mu
        var = jnp.mean(d * d, axis=-1, keepdims=True)
        h = d * jax.lax.rsqrt(var + 1e-5)
        h = h * g_ref[...] + bt_ref[...]
        h = jnp.maximum(h, 0.0)
        o_ref[...] = (jnp.dot(h, w2_ref[...], preferred_element_type=jnp.float32)
                      + b2_ref[...]).astype(o_ref.dtype)


def invariant_head_mlp(x, w1, b1, gamma, beta, w2, b2):
    x = jnp.asarray(x, _IO_DTYPE)
    w1 = jnp.asarray(w1, _IO_DTYPE)
    b, t = x.shape
    hh = w1.shape[1]
    od = w2.shape[1]

    tb, b_pad = _pick_rows_block(b)

    t_pad = t
    if t > 128 and t % 128 != 0:
        t_pad = _round_up(t, 128)
    tkt = _pick_reduce_block(t_pad, tb, hh)

    if b_pad != b or t_pad != t:
        x = jnp.pad(x, ((0, b_pad - b), (0, t_pad - t)))
    if t_pad != t:
        w1 = jnp.pad(w1, ((0, t_pad - t), (0, 0)))

    grid = (b_pad // tb, t_pad // tkt)
    out = pl.pallas_call(
        _head_mlp_kernel,
        out_shape=jax.ShapeDtypeStruct((b_pad, od), jnp.float32),
        grid_spec=pltpu.PrefetchScalarGridSpec(
            num_scalar_prefetch=0,
            grid=grid,
            in_specs=[
                pl.BlockSpec((tb, tkt), lambda i, kk: (i, kk)),
                pl.BlockSpec((tkt, hh), lambda i, kk: (kk, 0)),
                pl.BlockSpec((1, hh), lambda i, kk: (0, 0)),
                pl.BlockSpec((1, hh), lambda i, kk: (0, 0)),
                pl.BlockSpec((1, hh), lambda i, kk: (0, 0)),
                pl.BlockSpec((hh, od), lambda i, kk: (0, 0)),
                pl.BlockSpec((1, od), lambda i, kk: (0, 0)),
            ],
            out_specs=pl.BlockSpec((tb, od), lambda i, kk: (i, 0)),
            scratch_shapes=[pltpu.VMEM((tb, hh), jnp.float32)],
        ),
        compiler_params=_compiler_params(("parallel", "arbitrary")),
    )(x, w1,
      jnp.asarray(b1, jnp.float32).reshape(1, -1),
      jnp.asarray(gamma, jnp.float32).reshape(1, -1),
      jnp.asarray(beta, jnp.float32).reshape(1, -1),
      jnp.asarray(w2, jnp.float32),
      jnp.asarray(b2, jnp.float32).reshape(1, -1))
    return out[:b]


# --------------------------------------------------------------------------- #
# GLInvariantMLP (equivariant trunk in jnp, invariant head via Pallas)
# --------------------------------------------------------------------------- #

def _gl_nonlin(us, vs):
    # Row/col sums of u @ v^T without materializing the (B, L, H, H) gram:
    #   sum_j (u v^T)[i, j] = u[i, :] . (sum_j v[j, :])  (and symmetrically).
    v_col = jnp.sum(vs, axis=2)                                     # (B, L, k)
    u_col = jnp.sum(us, axis=2)                                     # (B, L, k)
    row = jnp.einsum("blik,blk->bli", us, v_col, precision=_PREC)   # sum over j
    col = jnp.einsum("bljk,blk->blj", vs, u_col, precision=_PREC)   # sum over i
    left = jnp.maximum(jnp.sign(row), 0.0)[..., None]
    right = jnp.maximum(jnp.sign(col), 0.0)[..., None]
    return left * us, right * vs


def _gl_nonlin_ref(us, vs):
    # Literal translation of GLNonlin.forward (materializes the gram) for validation.
    to_norm = jnp.einsum("blik,bljk->blij", us, vs, precision=_PREC)
    left = jnp.maximum(jnp.sign(jnp.sum(to_norm, axis=3)), 0.0)[..., None]
    right = jnp.maximum(jnp.sign(jnp.sum(to_norm, axis=2)), 0.0)[..., None]
    return left * us, right * vs


class GLInvariantMLP:
    """Pallas/JAX port of the PyTorch GLInvariantMLP forward pass."""

    def __init__(self, ns, ms, n_input_layers, out_dim, hidden_dim_equiv=128,
                 n_layers=0, hidden_dim_inv=128, clip=False, *, key):
        self.ns, self.ms = list(ns), list(ms)
        self.L = n_input_layers
        self.H = hidden_dim_equiv
        self.n_layers = n_layers
        self.Hinv = hidden_dim_inv
        self.out_dim = out_dim
        self.clip = clip

        n_eq = max(n_layers - 1, 0)
        n_keys = 2 * len(self.ns) + 2 * n_eq + 4
        keys = iter(jax.random.split(key, n_keys))

        # EquivariantLinear: w_1 (H, n_j), w_2 (H, m_j)
        self.first_w1 = [jax.random.normal(next(keys), (self.H, n)) / n ** 0.5
                         for n in self.ns]
        self.first_w2 = [jax.random.normal(next(keys), (self.H, m)) / m ** 0.5
                         for m in self.ms]
        # Hidden equivariant layers: (L, H, H)
        self.eq_u = [jax.random.normal(next(keys), (self.L, self.H, self.H)) / self.H ** 0.5
                     for _ in range(n_eq)]
        self.eq_v = [jax.random.normal(next(keys), (self.L, self.H, self.H)) / self.H ** 0.5
                     for _ in range(n_eq)]
        # Invariant head (weights stored input-major: y = x @ W + b)
        num_elem = 1 if clip else self.H * self.H
        t = self.L * num_elem
        self.total_length = t
        self.w1 = jax.random.normal(next(keys), (t, self.Hinv)) / t ** 0.5
        self.b1 = 0.01 * jax.random.normal(next(keys), (self.Hinv,))
        self.gamma = jnp.ones((self.Hinv,), jnp.float32)
        self.beta = jnp.zeros((self.Hinv,), jnp.float32)
        self.w2 = jax.random.normal(next(keys), (self.Hinv, out_dim)) / self.Hinv ** 0.5
        self.b2 = 0.01 * jax.random.normal(next(keys), (out_dim,))

    # ---- equivariant trunk (plain jnp) ------------------------------------ #
    # TODO(synk): fuse the equivariant trunk into Pallas if n_layers grows enough
    # for it to dominate the invariant head.
    def _trunk(self, uvs):
        us, vs = [], []
        for j, (u, v) in enumerate(uvs):
            us.append(jnp.einsum("hn,bnk->bhk", self.first_w1[j], u, precision=_PREC))
            vs.append(jnp.einsum("hm,bmk->bhk", self.first_w2[j], v, precision=_PREC))
        us = jnp.stack(us, axis=1)   # (B, L, H, k)
        vs = jnp.stack(vs, axis=1)
        for i in range(self.n_layers - 1):
            us1, vs1 = _gl_nonlin(us, vs)
            us = jnp.einsum("lij,bljk->blik", self.eq_u[i], us1, precision=_PREC)
            vs = jnp.einsum("lij,bljk->blik", self.eq_v[i], vs1, precision=_PREC)
        return us, vs

    # ---- full forward (Pallas invariant head) ------------------------------ #
    def __call__(self, uvs):
        us, vs = self._trunk(uvs)
        b, l, h, k = us.shape
        u_flat = us.reshape(b * l, h, k)
        v_flat = vs.reshape(b * l, h, k)
        if self.clip:
            gm = invariant_output(u_flat, v_flat, clip=True)      # (B*L, 1)
            x = gm.reshape(b, l)
        else:
            # TODO(synk): fuse this gram with linear1 to avoid the (B, L*H*H)
            # HBM intermediate (see header note).
            g = invariant_output(u_flat, v_flat, clip=False)      # (B*L, H, H)
            x = g.reshape(b, l * h * h)
        return invariant_head_mlp(x, self.w1, self.b1, self.gamma, self.beta,
                                  self.w2, self.b2)


def reference_forward(model, uvs):
    """Literal pure-jnp translation of the torch forward (for validation)."""
    # EquivariantMLP
    new_us, new_vs = [], []
    for j, (u, v) in enumerate(uvs):
        uv = jnp.concatenate(
            [jnp.einsum("hn,bnk->bhk", model.first_w1[j], u, precision=_PREC),
             jnp.einsum("hm,bmk->bhk", model.first_w2[j], v, precision=_PREC)],
            axis=1)
        new_us.append(uv[:, :model.H])
        new_vs.append(uv[:, model.H:])
    us = jnp.stack(new_us, axis=1)
    vs = jnp.stack(new_vs, axis=1)
    for i in range(model.n_layers - 1):
        us1, vs1 = _gl_nonlin_ref(us, vs)
        us = jnp.einsum("lij,bljk->blik", model.eq_u[i], us1, precision=_PREC)
        vs = jnp.einsum("lij,bljk->blik", model.eq_v[i], vs1, precision=_PREC)
    # InvariantHead
    b = us.shape[0]
    feats = []
    for ll in range(model.L):
        g = jnp.einsum("bik,bjk->bij", us[:, ll], vs[:, ll], precision=_PREC)
        if model.clip:
            feats.append(jnp.mean(g, axis=(-1, -2))[:, None])
        else:
            feats.append(g.reshape(b, -1))
    x = jnp.concatenate(feats, axis=1)
    hmid = jnp.dot(x, model.w1, precision=_PREC) + model.b1
    mu = jnp.mean(hmid, axis=-1, keepdims=True)
    var = jnp.mean((hmid - mu) ** 2, axis=-1, keepdims=True)
    hmid = (hmid - mu) / jnp.sqrt(var + 1e-5) * model.gamma + model.beta
    hmid = jnp.maximum(hmid, 0.0)
    return jnp.dot(hmid, model.w2, precision=_PREC) + model.b2


# --------------------------------------------------------------------------- #
# main
# --------------------------------------------------------------------------- #

if __name__ == "__main__":
    key = jax.random.PRNGKey(0)

    # ---- direct InvariantOutput kernel checks -------------------------------
    k1, k2, k3, k4, key = jax.random.split(key, 5)
    B, n, m, kk = 4, 8, 16, 32
    u = jax.random.normal(k1, (B, n, kk), dtype=jnp.float32)
    v = jax.random.normal(k2, (B, m, kk), dtype=jnp.float32)

    g = jax.block_until_ready(invariant_output(u, v, clip=False))
    g_ref = jnp.einsum("bnk,bmk->bnm", u, v, precision=_PREC)
    assert g.shape == (B, n, m)
    assert jnp.allclose(g, g_ref, atol=1e-3, rtol=1e-3)

    gm = jax.block_until_ready(invariant_output(u, v, clip=True))
    gm_ref = jnp.mean(g_ref, axis=(-1, -2))[:, None]
    assert gm.shape == (B, 1)
    assert jnp.allclose(gm, gm_ref, atol=1e-3, rtol=1e-3)

    # k-tiled accumulator path (used automatically for large n/m/k)
    u_big = jax.random.normal(k3, (2, 256, 256), dtype=jnp.float32)
    v_big = jax.random.normal(k4, (2, 256, 256), dtype=jnp.float32)
    g_big = jax.block_until_ready(invariant_output(u_big, v_big, clip=False,
                                                   force_tiled=True))
    g_big_ref = jnp.einsum("bnk,bmk->bnm", u_big, v_big, precision=_PREC)
    assert jnp.allclose(g_big, g_big_ref, atol=1e-2, rtol=1e-3)

    # clip path with a batch large enough to exercise the lane-dense multi-step grid
    k5, k6, key = jax.random.split(key, 3)
    u_med = jax.random.normal(k5, (2048, 32, 16), dtype=jnp.float32)
    v_med = jax.random.normal(k6, (2048, 32, 16), dtype=jnp.float32)
    gm_med = jax.block_until_ready(invariant_output(u_med, v_med, clip=True))
    gm_med_ref = jnp.mean(
        jnp.einsum("bnk,bmk->bnm", u_med, v_med, precision=_PREC),
        axis=(-1, -2))[:, None]
    assert gm_med.shape == (2048, 1)
    assert jnp.allclose(gm_med, gm_med_ref, atol=1e-3, rtol=1e-3)

    # ---- head MLP with a tiled (multi-step) reduction dim --------------------
    k7, k8, k9, key = jax.random.split(key, 4)
    th, hhh, odh = 16384, 128, 8
    xh = jax.random.normal(k7, (4, th), dtype=jnp.float32)
    w1h = jax.random.normal(k8, (th, hhh), dtype=jnp.float32) / th ** 0.5
    b1h = 0.01 * jax.random.normal(k9, (hhh,), dtype=jnp.float32)
    gammah = jnp.ones((hhh,), jnp.float32)
    betah = jnp.zeros((hhh,), jnp.float32)
    w2h = jax.random.normal(k9, (hhh, odh), dtype=jnp.float32) / hhh ** 0.5
    b2h = jnp.zeros((odh,), jnp.float32)
    yh = jax.block_until_ready(
        invariant_head_mlp(xh, w1h, b1h, gammah, betah, w2h, b2h))
    href = jnp.dot(xh, w1h, precision=_PREC) + b1h
    muh = jnp.mean(href, axis=-1, keepdims=True)
    varh = jnp.mean((href - muh) ** 2, axis=-1, keepdims=True)
    href = (href - muh) / jnp.sqrt(varh + 1e-5) * gammah + betah
    href = jnp.maximum(href, 0.0)
    yh_ref = jnp.dot(href, w2h, precision=_PREC) + b2h
    assert yh.shape == (4, odh)
    assert jnp.allclose(yh, yh_ref, atol=3e-2, rtol=3e-2)

    # ---- full GLInvariantMLP forward -----------------------------------------
    ns, ms = [6, 10], [8, 12]
    L, B2, kcols = 2, 2, 16
    H, Hinv, out_dim, n_layers = 32, 64, 5, 2

    keym, key = jax.random.split(key)
    uv_keys = jax.random.split(key, 2 * L)
    uvs = []
    for j in range(L):
        uu = jax.random.normal(uv_keys[2 * j], (B2, ns[j], kcols), dtype=jnp.float32)
        vv = jax.random.normal(uv_keys[2 * j + 1], (B2, ms[j], kcols), dtype=jnp.float32)
        uvs.append((uu, vv))

    model = GLInvariantMLP(ns, ms, n_input_layers=L, out_dim=out_dim,
                           hidden_dim_equiv=H, n_layers=n_layers,
                           hidden_dim_inv=Hinv, clip=False, key=keym)
    out = jax.block_until_ready(model(uvs))
    ref = reference_forward(model, uvs)
    assert out.shape == (B2, out_dim)
    assert jnp.allclose(out, ref, atol=2e-3, rtol=2e-3)

    model_clip = GLInvariantMLP(ns, ms, n_input_layers=L, out_dim=out_dim,
                                hidden_dim_equiv=H, n_layers=n_layers,
                                hidden_dim_inv=Hinv, clip=True, key=keym)
    out_c = jax.block_until_ready(model_clip(uvs))
    ref_c = reference_forward(model_clip, uvs)
    assert out_c.shape == (B2, out_dim)
    assert jnp.allclose(out_c, ref_c, atol=2e-3, rtol=2e-3)

    print("KERNEL_OK")
</pallas_src>

<mosaic_0001>
module attributes {stable_mosaic.version = 11 : i64} {
  func.func @_gram_kernel(%arg0: i32, %arg1: memref<2x8x32xf32, #tpu.memory_space<vmem>>, %arg2: memref<2x16x32xf32, #tpu.memory_space<vmem>>, %arg3: memref<2x8x16xf32, #tpu.memory_space<vmem>>) attributes {dimension_semantics = [#tpu.dimension_semantics<parallel>], iteration_bounds = array<i64: 2>, scalar_prefetch = 0 : i64, scratch_operands = 0 : i64, tpu.core_type = #tpu.core_type<tc>, window_params = [{transform_indices = @transform_0, window_bounds = array<i64: 2, 8, 32>}, {transform_indices = @transform_1, window_bounds = array<i64: 2, 16, 32>}, {transform_indices = @transform_2, window_bounds = array<i64: 2, 8, 16>}]} {
    %c0 = arith.constant 0 : index
    %c0_0 = arith.constant 0 : index
    %c0_1 = arith.constant 0 : index
    %0 = vector.load %arg1[%c0, %c0_0, %c0_1] : memref<2x8x32xf32, #tpu.memory_space<vmem>>, vector<2x8x32xf32>
    %c0_2 = arith.constant 0 : index
    %c0_3 = arith.constant 0 : index
    %c0_4 = arith.constant 0 : index
    %1 = vector.load %arg2[%c0_2, %c0_3, %c0_4] : memref<2x16x32xf32, #tpu.memory_space<vmem>>, vector<2x16x32xf32>
    "tpu.trace_start"() <{level = 10 : i32, message = "bnk,bmk->bnm"}> : () -> ()
    %cst = arith.constant dense<0.000000e+00> : vector<2x8x16xf32>
    %2 = tpu.matmul %0, %1, %cst {dimension_numbers = #tpu.dot_dimension_numbers<[2], [2], [1], [1], [0, 0, 0, 1, 1, 1], [0], [0]>} : vector<2x8x32xf32>, vector<2x16x32xf32>, vector<2x8x16xf32> -> vector<2x8x16xf32>
    "tpu.trace_stop"() : () -> ()
    %c0_5 = arith.constant 0 : index
    %c0_6 = arith.constant 0 : index
    %c0_7 = arith.constant 0 : index
    %3 = vector.load %arg3[%c0_5, %c0_6, %c0_7] : memref<2x8x16xf32, #tpu.memory_space<vmem>>, vector<2x8x16xf32>
    tpu.vector_store %arg3[%c0_5, %c0_6, %c0_7], %2 {strides = array<i32>} : memref<2x8x16xf32, #tpu.memory_space<vmem>>, vector<2x8x16xf32>,
    return
  }
  func.func @transform_0(%arg0: i32) -> (i32, i32, i32) {
    %c0_i32 = arith.constant 0 : i32
    %c0_i32_0 = arith.constant 0 : i32
    %c0_i32_1 = arith.constant 0 : i32
    return %arg0, %c0_i32, %c0_i32_0 : i32, i32, i32
  }
  func.func @transform_1(%arg0: i32) -> (i32, i32, i32) {
    %c0_i32 = arith.constant 0 : i32
    %c0_i32_0 = arith.constant 0 : i32
    %c0_i32_1 = arith.constant 0 : i32
    return %arg0, %c0_i32, %c0_i32_0 : i32, i32, i32
  }
  func.func @transform_2(%arg0: i32) -> (i32, i32, i32) {
    %c0_i32 = arith.constant 0 : i32
    %c0_i32_0 = arith.constant 0 : i32
    %c0_i32_1 = arith.constant 0 : i32
    return %arg0, %c0_i32, %c0_i32_0 : i32, i32, i32
  }
}

</mosaic_0001>

<bundles_post_ra>
// kernel: tpu_custom_call.1
= control target key start
LH: loop header
LB: loop body
LE: loop exit
PB: predicated region body
PF: predicated region fallthrough
CT: control target
= control target key end

     0   :  { %7 = vsyncpa [#allocation3], 0  ;;  %s978_s0 = inlined_call_operand.hbm [shape: f32[4,8,32], index: 0, kind: input, shape index: {}]   ;;  %s979_s1 = inlined_call_operand.hbm [shape: f32[4,16,32], index: 1, kind: input, shape index: {}]   ;;  %s980_s2 = inlined_call_operand.hbm [shape: f32[4,8,16], index: 2, kind: output, shape index: {}]  }
   0x1   :  { %9 = vsyncpa [#allocation3 + $0x1], 0 }
   0x2   :  { %10 = vsyncpa [#allocation6], 0 }
   0x3   :  { %12 = vsyncpa [#allocation6 + $0x1], 0 }
   0x4   :  { %13 = vsyncpa [#allocation4], 0 }
   0x5   :  { %15 = vsyncpa [#allocation4 + $0x1], 0  ;;  %s756_s9 = smov 0   ;;  %s758_s10 = smov 0  }
   0x6   :  { %s760_s11 = smov 0   ;;  %s762_s12 = smov 0  }
   0x7 LB: > { %s777_s13 = sadd.s32 4294967295, %s729_s12   ;;  %s484_s14 = sadd.s32 4294967294, %s729_s12   ;;  %s729_s12 = sphi %s762_s12, %s996_s12   ;;  %s725_s11 = sphi %s760_s11, %s995_s11   ;;  %s721_s10 = sphi %s758_s10, %s994_s10   ;;  %s717_s9 = sphi %s756_s9, %s993_s9  }
   0x8   : > { %s781_s15 = sadd.s32 1, %s729_s12   ;;  %s28_s16 = sadd.s32 1, %s725_s11 }
   0x9   : > { %s25_s17 = ssub.s32 %s729_s12, %s781_s15  ;;  %p35_p0 = scmp.ne.s32.totalorder %s725_s11, %s721_s10 }
   0xa   : > { %p26_p1 = scmp.eq.s32.totalorder %s25_s17, 0  ;;  %p36_p2 = scmp.eq.s32.totalorder %s729_s12, 0 }
   0xb   : > { %p41_p3 = scmp.ne.s32.totalorder %s721_s10, %s717_s9  ;;  %p42_p4 = scmp.eq.s32.totalorder %s777_s13, 0 }
   0xc   : > { %s793_s18 = scalar_select %p26_p1, %s725_s11, %s28_s16  }
   0xd   : > { %p795_p5 = por %p36_p2, %p35_p0  ;;  %p799_p6 = por %p42_p4, %p41_p3 }
   0xe   : > { %p91_p7 = scmp.eq.s32.totalorder %s777_s13, 1  ;;  %p97_p8 = scmp.eq.s32.totalorder %s484_s14, 1 }
   0xf   : > { %s984_s20 = scalar_select %p799_p6, 1, 0 }
  0x10   : > { %p558_p10 = scmp.lt.s32.totalorder %s729_s12, 2  ;;  %p806_p11 = por %p91_p7, %p35_p0 }
  0x11   : > { %p810_p12 = por %p97_p8, %p41_p3  ;;  %s815_s23 = sand.u32 1, %s725_s11  }
  0x12   : > { %s985_s21 = scalar_select %p806_p11, 1, 0 }
  0x13   : > { %s986_s22 = scalar_select %p810_p12, 1, 0 }
  0x14   : > { %s509_s24 = sshll.u32 %s729_s12, 8  ;;  %s487_s25 = sshll.u32 %s815_s23, 4 }
  0x15   : > { %s822_s28 = scalar_lea.hbm %s978_s0, %s509_s24  ;;  %s121_s29 = scalar_lea.vmem [#allocation2], %s487_s25 }
  0x16   : > { %s128_s30 = sshll.u32 %s121_s29, 4  ;;  %p826_p13 = pnand %p558_p10, %p795_p5  ;;  %s830_s30 = int_to_ptr.vmem [resolvable:$true] %s128_s30 }
  0x17   : > { %s118_s4 = scalar_lea.sflag [#allocation3], %s815_s23  ;;  %s599_s5 = scalar_lea.hbm %s822_s28, 256 }
  0x18   : > { %p600_p0 = scmp.ne.s32.totalorder %s822_s28, %s599_s5  ;;  %p601_p1 = pneg %p826_p13 }
  0x19   : > { %s604_s8 = scalar_lea.hbm %s978_s0, 512  ;;  %p605_p4 = scmp.lt.u32.totalorder %s822_s28, %s978_s0 }
  0x1a   : > { %p602_p2 = pnand %p601_p1, %p600_p0  ;;  %p606_p5 = scmp.lt.u32.totalorder %s604_s8, %s599_s5 }
  0x1b   : > { %p608_p8 = scmp.lt.u32.totalorder %s599_s5, %s822_s28 }
  0x1c   : > { %p603_p3 = pneg %p602_p2  ;;  %p607_p7 = por %p606_p5, %p605_p4 }
  0x1e   : > { %p609_p10 = por %p608_p8, %p607_p7 }
  0x20   : > { %p610_p9 = pnand %p609_p10, %p603_p3 }
  0x22   : > { %613 = shalt.err (!%p610_p9)
}
  0x23   : > { %s614_s17 = scalar_lea.vmem %s830_s30, 256  ;;  %s731_s19 = smov [#allocation2]  }
  0x24   : > { %p615_p0 = scmp.ne.s32.totalorder %s830_s30, %s614_s17  ;;  %s619_s24 = sshll.u32 %s731_s19, 4  ;;  %s620_s24 = int_to_ptr.vmem [resolvable:$false] %s619_s24 }
  0x25   : > { %s621_s25 = scalar_lea.vmem %s620_s24, 512  ;;  %p622_p11 = scmp.lt.s32.totalorder %s830_s30, %s620_s24 }
  0x26   : > { %p617_p2 = pnand %p615_p0, %p601_p1  ;;  %p623_p4 = scmp.lt.s32.totalorder %s621_s25, %s614_s17 }
  0x28   : > { %p618_p12 = pneg %p617_p2  ;;  %p624_p5 = por %p623_p4, %p622_p11 }
  0x2a   : > { %p625_p7 = pnand %p624_p5, %p618_p12 }
  0x2c   : > { %628 = shalt.err (!%p625_p7)
}
  0x2d   : > { %s732_s26 = smov 128   ;;  %s733_s27 = smov 8  }
  0x2e   : > { %550 = dma.hbm_to_vmem [thread:$0]  (!%p826_p13), %s822_s28, 256, %s830_s30, %s118_s4, %s732_s26, %s732_s26, %s733_s27  }
  0x2f   : > { %p494_p9 = scmp.ge.s32.totalorder %s729_s12, 1  ;;  %p158_p11 = scmp.lt.s32.totalorder %s729_s12, 3 }
  0x30   : > { %s490_s29 = sshll.u32 %s815_s23, 5  ;;  %s511_s6 = sshll.u32 %s729_s12, 9 }
  0x31   : > { %p866_p12 = pnand %p494_p9, %p158_p11  ;;  %s142_s7 = scalar_lea.vmem [#allocation5], %s490_s29 }
  0x32   : > { %s150_s8 = sshll.u32 %s142_s7, 4  ;;  %s874_s17 = scalar_lea.hbm %s979_s1, %s511_s6  ;;  %s876_s8 = int_to_ptr.vmem [resolvable:$true] %s150_s8 }
  0x33   : > { %s139_s28 = scalar_lea.sflag [#allocation6], %s815_s23  ;;  %s629_s30 = scalar_lea.hbm %s874_s17, 512 }
  0x34   : > { %p630_p3 = scmp.ne.s32.totalorder %s874_s17, %s629_s30  ;;  %s634_s24 = scalar_lea.hbm %s979_s1, 1024 }
  0x35   : > { %p635_p0 = scmp.lt.u32.totalorder %s874_s17, %s979_s1  ;;  %p636_p2 = scmp.lt.u32.totalorder %s634_s24, %s629_s30 }
  0x36   : > { %p632_p8 = pnand %p630_p3, %p601_p1  ;;  %p638_p5 = scmp.lt.u32.totalorder %s629_s30, %s874_s17 }
  0x37   : > { %p637_p4 = por %p636_p2, %p635_p0 }
  0x38   : > { %p633_p10 = pneg %p632_p8 }
  0x39   : > { %p639_p7 = por %p638_p5, %p637_p4 }
  0x3b   : > { %p640_p9 = pnand %p639_p7, %p633_p10 }
  0x3d   : > { %643 = shalt.err (!%p640_p9)
}
  0x3e   : > { %s644_s6 = scalar_lea.vmem %s876_s8, 512  ;;  %s734_s7 = smov [#allocation5]  }
  0x3f   : > { %p645_p11 = scmp.ne.s32.totalorder %s876_s8, %s644_s6  ;;  %s649_s14 = sshll.u32 %s734_s7, 4  ;;  %s650_s14 = int_to_ptr.vmem [resolvable:$false] %s649_s14 }
  0x40   : > { %s651_s16 = scalar_lea.vmem %s650_s14, 1024  ;;  %p652_p6 = scmp.lt.s32.totalorder %s876_s8, %s650_s14 }
  0x41   : > { %p647_p3 = pnand %p645_p11, %p601_p1  ;;  %p653_p0 = scmp.lt.s32.totalorder %s651_s16, %s644_s6 }
  0x43   : > { %p648_p8 = pneg %p647_p3  ;;  %p654_p2 = por %p653_p0, %p652_p6 }
  0x45   : > { %p655_p4 = pnand %p654_p2, %p648_p8 }
  0x47   : > { %658 = shalt.err (!%p655_p4)
}
  0x48   : > { %553 = dma.hbm_to_vmem [thread:$0]  (!%p826_p13), %s874_s17, 512, %s876_s8, %s139_s28, %s732_s26, %s732_s26, %s733_s27  }
  0x49   : > { %162 = sbr.rel (%p866_p12) target bundleno = 323 (0x143), region = 28  ;;  %s910_s30 = sand.u32 (!%p866_p12), 1, %s721_s10  }
  0x4a   : > { %s495_s4 = sshll.u32 (!%p866_p12), %s910_s30, 4  ;;  %s165_s3 = scalar_lea.sflag (!%p866_p12), [#allocation3], %s910_s30 }
  0x4b   : > { %s168_s19 = scalar_lea.vmem (!%p866_p12), [#allocation2], %s495_s4  ;;  %p989_p6 = scmp.ne.s32.totalorder (!%p866_p12), %s984_s20, 0 }
  0x50   : > { %704 = dma.done.wait (%p989_p6), %s165_s3, 256  }
  0x51   : > { %706 = vsyncadd (%p989_p6), %s165_s3, 4294967040  ;;  %s496_s23 = sshll.u32 %s910_s30, 5  ;;  %s174_s26 = scalar_lea.sflag [#allocation6], %s910_s30 }
  0x52   : > { %s177_s27 = scalar_lea.vmem [#allocation5], %s496_s23 }
  0x53   : > { %708 = dma.done.wait (%p989_p6), %s174_s26, 512  }
  0x54   : > { %710 = vsyncadd (%p989_p6), %s174_s26, 4294966784  ;;  %v735_v0 = vmov 0.0|0.0   ;;  %vm736_vm0 = vmmov 0   ;;  %v737_v1 = vmov 0.0   ;;  %vm212_vm1 = vcmask 261120   ;;  %v208_v2 = vld [vmem:[%s177_s27] sm:$0xff] }
  0x55   : > { %533 = vmatprep.subr.bf16.mxu0 %v735_v0  ;;  %537 = vmatprep.subr.bf16.mxu1 %v735_v0  ;;  %vm535_vm2 = vmpackc.low %vm212_vm1, %vm212_vm1  ;;  %v209_v3 = vld [vmem:[%s177_s27 + $0x8] sm:$0xff]  ;;  %v210_v4 = vld [vmem:[%s177_s27 + $0x10] sm:$0xff]  ;;  %s202_s20 = scalar_lea.vmem [#allocation7], %s495_s4  ;;  %s512_s8 = sshll.u32 %s777_s13, 8  ;;  %vm371_vm3 = vcmask 130048  }
  0x56   : > { %523 = vmatprep.mubr.msk.f32.mxu0 %vm736_vm0, %v737_v1  ;;  %530 = vmatprep.mubr.msk.f32.mxu1 %vm736_vm0, %v737_v1  ;;  %v534_v5 = vpack.c.bf16 %v209_v3, %v208_v2  ;;  %v211_v6 = vld [vmem:[%s177_s27 + $0x18] sm:$0xff]  ;;  %v206_v8 = vld [vmem:[%s168_s19] sm:$0xff]  ;;  %s388_s5 = sshll.u32 %s202_s20, 4  ;;  %s934_s24 = scalar_lea.hbm %s980_s2, %s512_s8  ;;  %s929_s5 = int_to_ptr.vmem [resolvable:$true] %s388_s5 }
  0x57   : > { %v538_v7 = vpack.c.bf16 %v211_v6, %v210_v4  ;;  %v207_v9 = vld [vmem:[%s168_s19 + $0x8] sm:$0xff]  ;;  %s375_s25 = scalar_lea.sflag [#allocation4], %s910_s30  ;;  %s659_s29 = scalar_lea.vmem %s929_s5, 256 }
  0x58   : > { %536 = vmatpush3.bf16.xpose.msk.msra.mxu0 %vm535_vm2, %v534_v5  ;;  %p660_p13 = scmp.ne.s32.totalorder %s929_s5, %s659_s29  ;;  %p990_p1 = scmp.ne.s32.totalorder %s985_s21, 0 }
  0x59   : > { %540 = vmatpush3.bf16.xpose.msk.msra.mxu1 %vm535_vm2, %v538_v7  ;;  %s738_s13 = smov [#allocation7]  }
  0x5a   : > { %p661_p12 = pnand %p660_p13, %p990_p1  ;;  %s663_s6 = sshll.u32 %s738_s13, 4  ;;  %s664_s6 = int_to_ptr.vmem [resolvable:$false] %s663_s6 }
  0x5b   : > { %s665_s7 = scalar_lea.vmem %s664_s6, 512  ;;  %p666_p5 = scmp.lt.s32.totalorder %s929_s5, %s664_s6 }
  0x5c   : > { %p662_p10 = pneg %p661_p12  ;;  %p667_p7 = scmp.lt.s32.totalorder %s665_s7, %s659_s29 }
  0x5e   : > { %p668_p9 = por %p667_p7, %p666_p5 }
  0x5f   : > { %524 = vmatmul.mubr.msk.f32.vlgmr.msra.gmra.mrb[0].mxu0 %vm212_vm1, %v206_v8 }
  0x60   : > { %531 = vmatmul.mubr.msk.f32.vlgmr.msra.gmra.mrb[0].mxu1 %vm212_vm1, %v207_v9  ;;  %p669_p11 = pnand %p668_p9, %p662_p10 }
 0x132   : > { %v288_v10 = vpop.f32.mrb[0].mxu0 }
 0x133   : > { %372 = vst.msk [vmem:[%s202_s20] sm:$0xff] %vm371_vm3, %v288_v10  ;;  %v367_v11 = vpop.f32.mrb[0].mxu1  ;;  %v525_v12 = vpop.f32.mrb[1].mxu0 }
 0x134   : > { %373 = vst.msk [vmem:[%s202_s20 + $0x8] sm:$0xff] %vm371_vm3, %v367_v11  ;;  %v532_v13 = vpop.f32.mrb[1].mxu1 }
 0x135   : > { %672 = shalt.err (!%p669_p11)
}
 0x136   : > { %s673_s14 = scalar_lea.hbm %s934_s24, 256  ;;  %s677_s3 = scalar_lea.hbm %s980_s2, 512 }
 0x137   : > { %p674_p3 = scmp.ne.s32.totalorder %s934_s24, %s673_s14  ;;  %p678_p2 = scmp.lt.u32.totalorder %s934_s24, %s980_s2 }
 0x138   : > { %p679_p4 = scmp.lt.u32.totalorder %s677_s3, %s673_s14  ;;  %p681_p13 = scmp.lt.u32.totalorder %s673_s14, %s934_s24 }
 0x139   : > { %p675_p8 = pnand %p674_p3, %p990_p1 }
 0x13a   : > { %p680_p6 = por %p679_p4, %p678_p2 }
 0x13b   : > { %p676_p0 = pneg %p675_p8 }
 0x13c   : > { %p682_p12 = por %p681_p13, %p680_p6 }
 0x13e   : > { %p683_p10 = pnand %p682_p12, %p676_p0 }
 0x140   : > { %686 = shalt.err (!%p683_p10)
}
 0x141   : > { %s739_s26 = smov 128   ;;  %s740_s27 = smov 8  }
 0x142   : > { %545 = dma.vmem_to_hbm [thread:$0]  (%p990_p1), %s929_s5, 256, %s934_s24, %s375_s25, %s739_s26, %s739_s26, %s740_s27  }
 0x143 PF: > { %s403_s20 = sand.u32 1, %s717_s9   ;;  %p991_p5 = scmp.ne.s32.totalorder %s986_s22, 0 }
 0x144   : > { %p992_p7 = scmp.ge.s32.totalorder %s729_s12, 2  ;;  %s404_s8 = scalar_lea.sflag [#allocation4], %s403_s20 }
 0x146   : > { %p555_p9 = pnand %p992_p7, %p991_p5 }
 0x148   : > { %712 = dma.done.wait (!%p555_p9), %s404_s8, 256  }
 0x149   : > { %714 = vsyncadd (!%p555_p9), %s404_s8, 4294967040  ;;  %p18_p11 = scmp.ge.s32.totalorder %s781_s15, 4   ;;  %s993_s9 = smov %s721_s10 }
 0x14a   : > { %s994_s10 = smov %s725_s11  ;;  %s995_s11 = smov %s793_s18 }
 0x14b   : > { %s996_s12 = smov %s781_s15  ;;  %20 = sbr.rel (!%p18_p11) target bundleno = 7 (0x7), region = 86 }
 0x152   :  { %409 = vsyncpa [#allocation3], 1 }
 0x153   :  { %411 = vsyncpa [#allocation3 + $0x1], 1 }
 0x154   :  { %412 = vsyncpa [#allocation6], 1 }
 0x155   :  { %414 = vsyncpa [#allocation6 + $0x1], 1 }
 0x156   :  { %415 = vsyncpa [#allocation4], 1 }
 0x157   :  { %417 = vsyncpa [#allocation4 + $0x1], 1 }

</bundles_post_ra>
